<compile_context>
chip_gen: v5e
topology: v5e:2x2
jax: 0.10.0
libtpu: 0.0.40
codegen_flags: <defaults>
</compile_context>

<pallas_src>
import math

import jax
import jax.numpy as jnp
from jax import lax
from jax.experimental import pallas as pl
from jax.experimental.pallas import tpu as pltpu


# -----------------------------------------------------------------------------
# Kernel 1: fused Q/K/V projections over one row tile of (B*S, H).
# Weights are pre-transposed bf16; 1/sqrt(head_dim) folded into wq/bq.
# -----------------------------------------------------------------------------
def _proj_qkv_kernel(xq_ref, xk_ref, xv_ref,
                     wqT_ref, bq_ref, wkT_ref, bk_ref, wvT_ref, bv_ref,
                     q_ref, k_ref, v_ref):
    xq = xq_ref[...].astype(jnp.bfloat16)
    xk = xk_ref[...].astype(jnp.bfloat16)
    xv = xv_ref[...].astype(jnp.bfloat16)
    q = jnp.dot(xq, wqT_ref[...], preferred_element_type=jnp.float32) + bq_ref[...]
    k = jnp.dot(xk, wkT_ref[...], preferred_element_type=jnp.float32) + bk_ref[...]
    v = jnp.dot(xv, wvT_ref[...], preferred_element_type=jnp.float32) + bv_ref[...]
    q_ref[...] = q.astype(q_ref.dtype)   # bf16 inter-kernel store
    k_ref[...] = k.astype(k_ref.dtype)
    v_ref[...] = v.astype(v_ref.dtype)


# -----------------------------------------------------------------------------
# Kernel 2: attention for ALL heads of one (batch, q-tile) grid step.
#   q_ref: (tq, H) bf16,   k_ref/v_ref: (S, H) bf16  (resident across q tiles)
#   attn_ref: (n_heads, tq, S) f32,   ctx_ref: (tq, H) bf16 (lane-dense store)
# -----------------------------------------------------------------------------
def _make_attn_kernel(n_heads, head_dim):
    def _attn_kernel(q_ref, k_ref, v_ref, attn_ref, ctx_ref):
        q = q_ref[...]
        k = k_ref[...]
        v = v_ref[...]
        for h in range(n_heads):                      # static unroll over heads
            lo = h * head_dim
            hi = lo + head_dim
            qh = q[:, lo:hi]                          # static lane slices (VMEM-side)
            kh = k[:, lo:hi]
            vh = v[:, lo:hi]
            # energy = (Q/scale) @ K^T, no materialized transpose (contract dim 1).
            energy = lax.dot_general(qh, kh, (((1,), (1,)), ((), ())),
                                     preferred_element_type=jnp.float32)
            # Numerically-stable softmax in f32 (v5e-safe). Exact reciprocal:
            # `attention` is returned and compared against the f32 torch softmax.
            m = jnp.max(energy, axis=-1, keepdims=True)
            e = jnp.exp(energy - m)
            denom = jnp.sum(e, axis=-1, keepdims=True)
            attn_h = e * pl.reciprocal(denom, approx=False)
            attn_ref[h] = attn_h                      # (tq, S) f32, lane-dense in S
            ctx_h = jnp.dot(attn_h.astype(jnp.bfloat16), vh,
                            preferred_element_type=jnp.float32)
            ctx_ref[:, lo:hi] = ctx_h.astype(ctx_ref.dtype)
    return _attn_kernel


# -----------------------------------------------------------------------------
# Kernel 3: output projection over one row tile of (B*S, H).
# -----------------------------------------------------------------------------
def _proj_out_kernel(x_ref, woT_ref, bo_ref, o_ref):
    x = x_ref[...]                                    # already bf16
    o_ref[...] = (jnp.dot(x, woT_ref[...], preferred_element_type=jnp.float32)
                  + bo_ref[...]).astype(o_ref.dtype)


# -----------------------------------------------------------------------------
# Tile / VMEM heuristics
# -----------------------------------------------------------------------------
def _pick_row_tile(rows, hid):
    # Full extent for small problems (always a legal block); otherwise a fixed
    # 8-aligned tile + cdiv grid (Pallas masks the ragged tail) so we never
    # fall back to a single giant block (VMEM OOM / no pipelining).
    if rows <= 512:
        return rows
    return 512 if hid <= 2048 else 256


def _pick_q_tile(seq, n_heads):
    if seq <= 512:
        return seq
    tq = 512
    # Keep the double-buffered f32 (n_heads, tq, S) attention-prob block modest.
    while tq > 8 and n_heads * tq * seq * 4 > (8 << 20):
        tq //= 2
    return max(tq, 8)


def _vmem_limit(nbytes):
    # Explicit scoped-VMEM limit sized from per-step block arithmetic + headroom
    # (defaults of ~16/32 MiB are too small for the larger row tiles).
    return int(min(max(nbytes + (4 << 20), 32 << 20), 100 << 20))


# -----------------------------------------------------------------------------
# Wrapper
# -----------------------------------------------------------------------------
def multi_headed_attention(query, key, value, params, *, n_heads):
    """query/key/value: (B, S, H) float32. Returns (x, attention) like the torch module."""
    B, S, H = query.shape
    assert H % n_heads == 0
    hd = H // n_heads
    scale = math.sqrt(hd)

    wq, bq, wk, bk, wv, bv, wo, bo = params

    # One-time wrapper-side weight prep: pre-transpose (kernels do x @ W),
    # fold 1/sqrt(head_dim) into the Q projection, cast weights to bf16
    # (MXU operands); biases stay f32 for the f32 accumulators.
    wqT = (wq.T / scale).astype(jnp.bfloat16)
    wkT = wk.T.astype(jnp.bfloat16)
    wvT = wv.T.astype(jnp.bfloat16)
    woT = wo.T.astype(jnp.bfloat16)
    bq2 = (bq / scale).reshape(1, H).astype(jnp.float32)
    bk2 = bk.reshape(1, H).astype(jnp.float32)
    bv2 = bv.reshape(1, H).astype(jnp.float32)
    bo2 = bo.reshape(1, H).astype(jnp.float32)

    rows = B * S
    tr = _pick_row_tile(rows, H)
    n_row_tiles = pl.cdiv(rows, tr)

    row_spec = pl.BlockSpec((tr, H), lambda r: (r, 0))
    w_spec = pl.BlockSpec((H, H), lambda r: (0, 0))
    b_spec = pl.BlockSpec((1, H), lambda r: (0, 0))

    # ---- 1) fused Q/K/V projection: full-H-wide GEMMs per row tile ----------
    qkv_vmem = 2 * (3 * tr * H * 4 + 3 * tr * H * 2 + 3 * H * H * 2 + 3 * H * 4)
    Q, K, V = pl.pallas_call(
        _proj_qkv_kernel,
        out_shape=(jax.ShapeDtypeStruct((rows, H), jnp.bfloat16),
                   jax.ShapeDtypeStruct((rows, H), jnp.bfloat16),
                   jax.ShapeDtypeStruct((rows, H), jnp.bfloat16)),
        grid_spec=pltpu.PrefetchScalarGridSpec(
            num_scalar_prefetch=0,
            grid=(n_row_tiles,),
            in_specs=[row_spec, row_spec, row_spec,
                      w_spec, b_spec, w_spec, b_spec, w_spec, b_spec],
            out_specs=(row_spec, row_spec, row_spec),
        ),
        compiler_params=pltpu.CompilerParams(
            dimension_semantics=("parallel",),
            vmem_limit_bytes=_vmem_limit(qkv_vmem)),
    )(query.reshape(rows, H), key.reshape(rows, H), value.reshape(rows, H),
      wqT, bq2, wkT, bk2, wvT, bv2)

    # ---- 2) attention on a (B, q-tile) grid: no transposes, bf16 hops -------
    Q3 = Q.reshape(B, S, H)      # free reshapes, no data movement
    K3 = K.reshape(B, S, H)
    V3 = V.reshape(B, S, H)

    tq = _pick_q_tile(S, n_heads)
    n_q_tiles = pl.cdiv(S, tq)

    q_spec = pl.BlockSpec((None, tq, H), lambda b, qi: (b, qi, 0))
    kv_spec = pl.BlockSpec((None, S, H), lambda b, qi: (b, 0, 0))   # resident across qi
    attn_spec = pl.BlockSpec((None, n_heads, tq, S), lambda b, qi: (b, 0, qi, 0))
    ctx_spec = pl.BlockSpec((None, tq, H), lambda b, qi: (b, qi, 0))

    attn_vmem = (2 * (tq * H * 2 + 2 * S * H * 2 + n_heads * tq * S * 4 + tq * H * 2)
                 + 4 * tq * S * 4)
    attn, ctx = pl.pallas_call(
        _make_attn_kernel(n_heads, hd),
        out_shape=(jax.ShapeDtypeStruct((B, n_heads, S, S), jnp.float32),
                   jax.ShapeDtypeStruct((B, S, H), jnp.bfloat16)),
        grid_spec=pltpu.PrefetchScalarGridSpec(
            num_scalar_prefetch=0,
            grid=(B, n_q_tiles),   # q-tiles innermost -> K/V blocks not re-fetched
            in_specs=[q_spec, kv_spec, kv_spec],
            out_specs=(attn_spec, ctx_spec),
        ),
        compiler_params=pltpu.CompilerParams(
            dimension_semantics=("parallel", "parallel"),
            vmem_limit_bytes=_vmem_limit(attn_vmem)),
    )(Q3, K3, V3)

    # ---- 3) output projection over all B*S rows (ctx already in (B,S,H)) ----
    out_vmem = 2 * (tr * H * 2 + tr * H * 4 + H * H * 2 + H * 4)
    x_out = pl.pallas_call(
        _proj_out_kernel,
        out_shape=jax.ShapeDtypeStruct((rows, H), jnp.float32),
        grid_spec=pltpu.PrefetchScalarGridSpec(
            num_scalar_prefetch=0,
            grid=(n_row_tiles,),
            in_specs=[row_spec, w_spec, b_spec],
            out_specs=row_spec,
        ),
        compiler_params=pltpu.CompilerParams(
            dimension_semantics=("parallel",),
            vmem_limit_bytes=_vmem_limit(out_vmem)),
    )(ctx.reshape(rows, H), woT, bo2)

    return x_out.reshape(B, S, H), attn


# -----------------------------------------------------------------------------
# Pure-JAX f32 reference mirroring the PyTorch forward (mask=None, eval mode)
# -----------------------------------------------------------------------------
def _reference(query, key, value, params, *, n_heads):
    wq, bq, wk, bk, wv, bv, wo, bo = params
    B, S, H = query.shape
    hd = H // n_heads
    scale = math.sqrt(hd)

    def lin(x, w, b):
        return jnp.einsum('bsh,oh->bso', x, w) + b

    Q = lin(query, wq, bq).reshape(B, S, n_heads, hd).transpose(0, 2, 1, 3)
    K = lin(key, wk, bk).reshape(B, S, n_heads, hd).transpose(0, 2, 1, 3)
    V = lin(value, wv, bv).reshape(B, S, n_heads, hd).transpose(0, 2, 1, 3)

    energy = jnp.einsum('bhqd,bhkd->bhqk', Q, K) / scale
    attention = jax.nn.softmax(energy, axis=-1)
    x = jnp.einsum('bhqk,bhkd->bhqd', attention, V)
    x = x.transpose(0, 2, 1, 3).reshape(B, S, H)
    x = jnp.einsum('bsh,oh->bso', x, wo) + bo
    return x, attention


if __name__ == "__main__":
    # Small deterministic config
    B, S, H, n_heads = 2, 8, 32, 4

    key0 = jax.random.PRNGKey(0)
    keys = jax.random.split(key0, 11)

    def init_linear(kw, kb, dim):
        bound = 1.0 / math.sqrt(dim)
        w = jax.random.uniform(kw, (dim, dim), jnp.float32, -bound, bound)
        b = jax.random.uniform(kb, (dim,), jnp.float32, -bound, bound)
        return w, b

    wq, bq = init_linear(keys[0], keys[1], H)
    wk, bk = init_linear(keys[2], keys[3], H)
    wv, bv = init_linear(keys[4], keys[5], H)
    wo, bo = init_linear(keys[6], keys[7], H)
    params = (wq, bq, wk, bk, wv, bv, wo, bo)

    query = jax.random.normal(keys[8], (B, S, H), jnp.float32)
    key_in = jax.random.normal(keys[9], (B, S, H), jnp.float32)
    value = jax.random.normal(keys[10], (B, S, H), jnp.float32)

    x_out, attn_out = multi_headed_attention(query, key_in, value, params, n_heads=n_heads)
    (x_out, attn_out) = jax.block_until_ready((x_out, attn_out))

    x_ref, attn_ref = _reference(query, key_in, value, params, n_heads=n_heads)
    # bf16 MXU operands / bf16 inter-kernel hops -> loosened tolerances vs f32 ref.
    assert jnp.allclose(x_out, x_ref, atol=3e-2, rtol=3e-2), \
        f"x max err {jnp.max(jnp.abs(x_out - x_ref))}"
    assert jnp.allclose(attn_out, attn_ref, atol=2e-2, rtol=2e-2), \
        f"attn max err {jnp.max(jnp.abs(attn_out - attn_ref))}"

    print("KERNEL_OK")
</pallas_src>

<mosaic_0001>
module attributes {stable_mosaic.version = 11 : i64} {
  func.func @_proj_qkv_kernel(%arg0: i32, %arg1: memref<16x32xf32, #tpu.memory_space<vmem>>, %arg2: memref<16x32xf32, #tpu.memory_space<vmem>>, %arg3: memref<16x32xf32, #tpu.memory_space<vmem>>, %arg4: memref<32x32xbf16, #tpu.memory_space<vmem>>, %arg5: memref<1x32xf32, #tpu.memory_space<vmem>>, %arg6: memref<32x32xbf16, #tpu.memory_space<vmem>>, %arg7: memref<1x32xf32, #tpu.memory_space<vmem>>, %arg8: memref<32x32xbf16, #tpu.memory_space<vmem>>, %arg9: memref<1x32xf32, #tpu.memory_space<vmem>>, %arg10: memref<16x32xbf16, #tpu.memory_space<vmem>>, %arg11: memref<16x32xbf16, #tpu.memory_space<vmem>>, %arg12: memref<16x32xbf16, #tpu.memory_space<vmem>>) attributes {dimension_semantics = [#tpu.dimension_semantics<parallel>], iteration_bounds = array<i64: 1>, scalar_prefetch = 0 : i64, scratch_operands = 0 : i64, tpu.core_type = #tpu.core_type<tc>, window_params = [{transform_indices = @transform_0, window_bounds = array<i64: 16, 32>}, {transform_indices = @transform_1, window_bounds = array<i64: 16, 32>}, {transform_indices = @transform_2, window_bounds = array<i64: 16, 32>}, {pipeline_mode = #tpu.pipeline_mode<synchronous>, transform_indices = @transform_3, window_bounds = array<i64: 32, 32>}, {pipeline_mode = #tpu.pipeline_mode<synchronous>, transform_indices = @transform_4, window_bounds = array<i64: 1, 32>}, {pipeline_mode = #tpu.pipeline_mode<synchronous>, transform_indices = @transform_5, window_bounds = array<i64: 32, 32>}, {pipeline_mode = #tpu.pipeline_mode<synchronous>, transform_indices = @transform_6, window_bounds = array<i64: 1, 32>}, {pipeline_mode = #tpu.pipeline_mode<synchronous>, transform_indices = @transform_7, window_bounds = array<i64: 32, 32>}, {pipeline_mode = #tpu.pipeline_mode<synchronous>, transform_indices = @transform_8, window_bounds = array<i64: 1, 32>}, {transform_indices = @transform_9, window_bounds = array<i64: 16, 32>}, {transform_indices = @transform_10, window_bounds = array<i64: 16, 32>}, {transform_indices = @transform_11, window_bounds = array<i64: 16, 32>}]} {
    %c0 = arith.constant 0 : index
    %c0_0 = arith.constant 0 : index
    %0 = vector.load %arg1[%c0, %c0_0] : memref<16x32xf32, #tpu.memory_space<vmem>>, vector<16x32xf32>
    %1 = arith.truncf %0 : vector<16x32xf32> to vector<16x32xbf16>
    %c0_1 = arith.constant 0 : index
    %c0_2 = arith.constant 0 : index
    %2 = vector.load %arg2[%c0_1, %c0_2] : memref<16x32xf32, #tpu.memory_space<vmem>>, vector<16x32xf32>
    %3 = arith.truncf %2 : vector<16x32xf32> to vector<16x32xbf16>
    %c0_3 = arith.constant 0 : index
    %c0_4 = arith.constant 0 : index
    %4 = vector.load %arg3[%c0_3, %c0_4] : memref<16x32xf32, #tpu.memory_space<vmem>>, vector<16x32xf32>
    %5 = arith.truncf %4 : vector<16x32xf32> to vector<16x32xbf16>
    %c0_5 = arith.constant 0 : index
    %c0_6 = arith.constant 0 : index
    %6 = vector.load %arg4[%c0_5, %c0_6] : memref<32x32xbf16, #tpu.memory_space<vmem>>, vector<32x32xbf16>
    %cst = arith.constant dense<0.000000e+00> : vector<16x32xf32>
    %7 = tpu.matmul %1, %6, %cst {dimension_numbers = #tpu.dot_dimension_numbers<[1], [0], [0], [1], [0, 0, 1, 1], [], []>} : vector<16x32xbf16>, vector<32x32xbf16>, vector<16x32xf32> -> vector<16x32xf32>
    %c0_7 = arith.constant 0 : index
    %c0_8 = arith.constant 0 : index
    %8 = vector.load %arg5[%c0_7, %c0_8] : memref<1x32xf32, #tpu.memory_space<vmem>>, vector<1x32xf32>
    %9 = vector.broadcast %8 : vector<1x32xf32> to vector<16x32xf32>
    %10 = arith.addf %7, %9 : vector<16x32xf32>
    %c0_9 = arith.constant 0 : index
    %c0_10 = arith.constant 0 : index
    %11 = vector.load %arg6[%c0_9, %c0_10] : memref<32x32xbf16, #tpu.memory_space<vmem>>, vector<32x32xbf16>
    %cst_11 = arith.constant dense<0.000000e+00> : vector<16x32xf32>
    %12 = tpu.matmul %3, %11, %cst_11 {dimension_numbers = #tpu.dot_dimension_numbers<[1], [0], [0], [1], [0, 0, 1, 1], [], []>} : vector<16x32xbf16>, vector<32x32xbf16>, vector<16x32xf32> -> vector<16x32xf32>
    %c0_12 = arith.constant 0 : index
    %c0_13 = arith.constant 0 : index
    %13 = vector.load %arg7[%c0_12, %c0_13] : memref<1x32xf32, #tpu.memory_space<vmem>>, vector<1x32xf32>
    %14 = vector.broadcast %13 : vector<1x32xf32> to vector<16x32xf32>
    %15 = arith.addf %12, %14 : vector<16x32xf32>
    %c0_14 = arith.constant 0 : index
    %c0_15 = arith.constant 0 : index
    %16 = vector.load %arg8[%c0_14, %c0_15] : memref<32x32xbf16, #tpu.memory_space<vmem>>, vector<32x32xbf16>
    %cst_16 = arith.constant dense<0.000000e+00> : vector<16x32xf32>
    %17 = tpu.matmul %5, %16, %cst_16 {dimension_numbers = #tpu.dot_dimension_numbers<[1], [0], [0], [1], [0, 0, 1, 1], [], []>} : vector<16x32xbf16>, vector<32x32xbf16>, vector<16x32xf32> -> vector<16x32xf32>
    %c0_17 = arith.constant 0 : index
    %c0_18 = arith.constant 0 : index
    %18 = vector.load %arg9[%c0_17, %c0_18] : memref<1x32xf32, #tpu.memory_space<vmem>>, vector<1x32xf32>
    %19 = vector.broadcast %18 : vector<1x32xf32> to vector<16x32xf32>
    %20 = arith.addf %17, %19 : vector<16x32xf32>
    %21 = arith.truncf %10 : vector<16x32xf32> to vector<16x32xbf16>
    %c0_19 = arith.constant 0 : index
    %c0_20 = arith.constant 0 : index
    %22 = vector.load %arg10[%c0_19, %c0_20] : memref<16x32xbf16, #tpu.memory_space<vmem>>, vector<16x32xbf16>
    tpu.vector_store %arg10[%c0_19, %c0_20], %21 {strides = array<i32>} : memref<16x32xbf16, #tpu.memory_space<vmem>>, vector<16x32xbf16>,
    %23 = arith.truncf %15 : vector<16x32xf32> to vector<16x32xbf16>
    %c0_21 = arith.constant 0 : index
    %c0_22 = arith.constant 0 : index
    %24 = vector.load %arg11[%c0_21, %c0_22] : memref<16x32xbf16, #tpu.memory_space<vmem>>, vector<16x32xbf16>
    tpu.vector_store %arg11[%c0_21, %c0_22], %23 {strides = array<i32>} : memref<16x32xbf16, #tpu.memory_space<vmem>>, vector<16x32xbf16>,
    %25 = arith.truncf %20 : vector<16x32xf32> to vector<16x32xbf16>
    %c0_23 = arith.constant 0 : index
    %c0_24 = arith.constant 0 : index
    %26 = vector.load %arg12[%c0_23, %c0_24] : memref<16x32xbf16, #tpu.memory_space<vmem>>, vector<16x32xbf16>
    tpu.vector_store %arg12[%c0_23, %c0_24], %25 {strides = array<i32>} : memref<16x32xbf16, #tpu.memory_space<vmem>>, vector<16x32xbf16>,
    return
  }
  func.func @transform_0(%arg0: i32) -> (i32, i32) {
    %c0_i32 = arith.constant 0 : i32
    %c0_i32_0 = arith.constant 0 : i32
    return %arg0, %c0_i32 : i32, i32
  }
  func.func @transform_1(%arg0: i32) -> (i32, i32) {
    %c0_i32 = arith.constant 0 : i32
    %c0_i32_0 = arith.constant 0 : i32
    return %arg0, %c0_i32 : i32, i32
  }
  func.func @transform_2(%arg0: i32) -> (i32, i32) {
    %c0_i32 = arith.constant 0 : i32
    %c0_i32_0 = arith.constant 0 : i32
    return %arg0, %c0_i32 : i32, i32
  }
  func.func @transform_3(%arg0: i32) -> (i32, i32) {
    %c0_i32 = arith.constant 0 : i32
    %c0_i32_0 = arith.constant 0 : i32
    %c0_i32_1 = arith.constant 0 : i32
    return %c0_i32, %c0_i32_0 : i32, i32
  }
  func.func @transform_4(%arg0: i32) -> (i32, i32) {
    %c0_i32 = arith.constant 0 : i32
    %c0_i32_0 = arith.constant 0 : i32
    %c0_i32_1 = arith.constant 0 : i32
    return %c0_i32, %c0_i32_0 : i32, i32
  }
  func.func @transform_5(%arg0: i32) -> (i32, i32) {
    %c0_i32 = arith.constant 0 : i32
    %c0_i32_0 = arith.constant 0 : i32
    %c0_i32_1 = arith.constant 0 : i32
    return %c0_i32, %c0_i32_0 : i32, i32
  }
  func.func @transform_6(%arg0: i32) -> (i32, i32) {
    %c0_i32 = arith.constant 0 : i32
    %c0_i32_0 = arith.constant 0 : i32
    %c0_i32_1 = arith.constant 0 : i32
    return %c0_i32, %c0_i32_0 : i32, i32
  }
  func.func @transform_7(%arg0: i32) -> (i32, i32) {
    %c0_i32 = arith.constant 0 : i32
    %c0_i32_0 = arith.constant 0 : i32
    %c0_i32_1 = arith.constant 0 : i32
    return %c0_i32, %c0_i32_0 : i32, i32
  }
  func.func @transform_8(%arg0: i32) -> (i32, i32) {
    %c0_i32 = arith.constant 0 : i32
    %c0_i32_0 = arith.constant 0 : i32
    %c0_i32_1 = arith.constant 0 : i32
    return %c0_i32, %c0_i32_0 : i32, i32
  }
  func.func @transform_9(%arg0: i32) -> (i32, i32) {
    %c0_i32 = arith.constant 0 : i32
    %c0_i32_0 = arith.constant 0 : i32
    return %arg0, %c0_i32 : i32, i32
  }
  func.func @transform_10(%arg0: i32) -> (i32, i32) {
    %c0_i32 = arith.constant 0 : i32
    %c0_i32_0 = arith.constant 0 : i32
    return %arg0, %c0_i32 : i32, i32
  }
  func.func @transform_11(%arg0: i32) -> (i32, i32) {
    %c0_i32 = arith.constant 0 : i32
    %c0_i32_0 = arith.constant 0 : i32
    return %arg0, %c0_i32 : i32, i32
  }
}

</mosaic_0001>

<bundles_post_ra>
// kernel: tpu_custom_call.1
= control target key start
LH: loop header
LB: loop body
LE: loop exit
PB: predicated region body
PF: predicated region fallthrough
CT: control target
= control target key end

     0   :  { %17 = vsyncpa [#allocation3], 0  ;;  %s733_s0 = inlined_call_operand.hbm [shape: f32[16,32], index: 0, kind: input, shape index: {}]   ;;  %s734_s1 = inlined_call_operand.hbm [shape: f32[16,32], index: 1, kind: input, shape index: {}]   ;;  %s735_s2 = inlined_call_operand.hbm [shape: f32[16,32], index: 2, kind: input, shape index: {}]   ;;  %s736_s3 = inlined_call_operand.hbm [shape: bf16[32,32], index: 3, kind: input, shape index: {}]   ;;  %s737_s4 = inlined_call_operand.vmem [shape: f32[1,32], index: 4, kind: input, shape index: {}]   ;;  %s738_s5 = inlined_call_operand.hbm [shape: bf16[32,32], index: 5, kind: input, shape index: {}]   ;;  %s739_s6 = inlined_call_operand.vmem [shape: f32[1,32], index: 6, kind: input, shape index: {}]   ;;  %s740_s7 = inlined_call_operand.hbm [shape: bf16[32,32], index: 7, kind: input, shape index: {}]   ;;  %s741_s8 = inlined_call_operand.vmem [shape: f32[1,32], index: 8, kind: input, shape index: {}]   ;;  %s742_s9 = inlined_call_operand.hbm [shape: bf16[16,32], index: 9, kind: output, shape index: {0}]   ;;  %s743_s10 = inlined_call_operand.hbm [shape: bf16[16,32], index: 10, kind: output, shape index: {1}]   ;;  %s744_s11 = inlined_call_operand.hbm [shape: bf16[16,32], index: 11, kind: output, shape index: {2}]  }
   0x1   :  { %18 = vsyncpa [#allocation6], 0 }
   0x2   :  { %19 = vsyncpa [#allocation9], 0 }
   0x3   :  { %20 = vsyncpa [#allocation12], 0 }
   0x4   :  { %21 = vsyncpa [#allocation4], 0 }
   0x5   :  { %22 = vsyncpa [#allocation15], 0  ;;  %s40_s19 = sshll.u32 %s734_s1, 4  ;;  %s600_s20 = smov [#allocation5]   ;;  %s41_s19 = int_to_ptr.hbm [resolvable:$true] %s40_s19 }
   0x6   :  { %s42_s21 = sshll.u32 %s600_s20, 4  ;;  %s66_s24 = sshll.u32 %s736_s3, 4  ;;  %s43_s21 = int_to_ptr.vmem [resolvable:$true] %s42_s21  ;;  %s67_s24 = int_to_ptr.hbm [resolvable:$true] %s66_s24 }
   0x7   :  { %s601_s25 = smov 128   ;;  %s602_s26 = smov 8  }
   0x8   :  { %48 = dma.hbm_to_vmem [thread:$0]  %s41_s19, 256, %s43_s21, [#allocation6], %s601_s25, %s601_s25, %s602_s26  }
   0x9   :  { %s603_s27 = smov [#allocation8]   ;;  %s604_s29 = smov 64  }
   0xa   :  { %s68_s28 = sshll.u32 %s603_s27, 4  ;;  %s605_s30 = smov 4   ;;  %s69_s28 = int_to_ptr.vmem [resolvable:$true] %s68_s28 }
   0xb   :  { %74 = dma.hbm_to_vmem [thread:$0]  %s67_s24, 256, %s69_s28, [#allocation9], %s604_s29, %s604_s29, %s605_s30  }
   0xc   :  { %s27_s13 = sshll.u32 %s733_s0, 4  ;;  %s606_s14 = smov [#allocation2]   ;;  %s28_s13 = int_to_ptr.hbm [resolvable:$true] %s27_s13 }
   0xd   :  { %s29_s3 = sshll.u32 %s606_s14, 4  ;;  %s53_s17 = sshll.u32 %s735_s2, 4  ;;  %s30_s3 = int_to_ptr.vmem [resolvable:$true] %s29_s3  ;;  %s54_s17 = int_to_ptr.hbm [resolvable:$true] %s53_s17 }
   0xe   :  { %35 = dma.hbm_to_vmem [thread:$0]  %s28_s13, 256, %s30_s3, [#allocation3], %s601_s25, %s601_s25, %s602_s26  }
   0xf   :  { %s607_s18 = smov [#allocation7]   ;;  %s81_s22 = sshll.u32 %s738_s5, 4  ;;  %s82_s22 = int_to_ptr.hbm [resolvable:$true] %s81_s22 }
  0x10   :  { %s55_s19 = sshll.u32 %s607_s18, 4  ;;  %s96_s24 = sshll.u32 %s740_s7, 4  ;;  %s56_s19 = int_to_ptr.vmem [resolvable:$true] %s55_s19  ;;  %s97_s24 = int_to_ptr.hbm [resolvable:$true] %s96_s24 }
  0x11   :  { %61 = dma.hbm_to_vmem [thread:$0]  %s54_s17, 256, %s56_s19, [#allocation6], %s601_s25, %s601_s25, %s602_s26  }
  0x12   :  { %s608_s27 = smov [#allocation10]   ;;  %s609_s2 = smov [#allocation11]  }
  0x13   :  { %s83_s28 = sshll.u32 %s608_s27, 4  ;;  %s98_s1 = sshll.u32 %s609_s2, 4  ;;  %s84_s28 = int_to_ptr.vmem [resolvable:$true] %s83_s28  ;;  %s99_s1 = int_to_ptr.vmem [resolvable:$true] %s98_s1 }
  0x14   :  { %89 = dma.hbm_to_vmem [thread:$0]  %s82_s22, 256, %s84_s28, [#allocation9], %s604_s29, %s604_s29, %s605_s30  }
  0x15   :  { %104 = dma.hbm_to_vmem [thread:$0]  %s97_s24, 256, %s99_s1, [#allocation12], %s604_s29, %s604_s29, %s605_s30  }
  0x16   :  { %588 = dma.done.wait [#allocation3], 256  }
  0x17   :  { %589 = vsyncadd [#allocation3], 4294967040 }
  0x18   :  { %590 = dma.done.wait [#allocation6], 512  }
  0x19   :  { %591 = vsyncadd [#allocation6], 4294966784 }
  0x1a   :  { %592 = dma.done.wait [#allocation9], 512  }
  0x1b   :  { %593 = vsyncadd [#allocation9], 4294966784 }
  0x1c   :  { %594 = dma.done.wait [#allocation12], 256  }
  0x1d   :  { %595 = vsyncadd [#allocation12], 4294967040  ;;  %v351_v0 = vld [vmem:[#allocation8 + $0x8] sm:$0xff]  ;;  %v353_v1 = vld [vmem:[#allocation10 + $0x8] sm:$0xff]  ;;  %vm161_vm0 = vcmask 261120   ;;  %vm255_vm1 = vcmask 257024  }
  0x1e   :  { %v355_v2 = vld [vmem:[#allocation11 + $0x8] sm:$0xff]  ;;  %v350_v3 = vld [vmem:[#allocation8] sm:$0xff]  ;;  %v352_v4 = vld [vmem:[#allocation10] sm:$0xff]  ;;  %171 = vmatpush.bf16.msra.mxu0 %v351_v0  ;;  %208 = vmatpush.bf16.msra.mxu1 %v353_v1  ;;  %s272_s15 = sshll.u32 %s742_s9, 4  ;;  %s611_s16 = smov [#allocation14]   ;;  %s273_s15 = int_to_ptr.hbm [resolvable:$true] %s272_s15 }
  0x1f   :  { %v354_v5 = vld [vmem:[#allocation11] sm:$0xff]  ;;  %v132_v6 = vld [vmem:[#allocation2] sm:$0xff]  ;;  %v133_v7 = vld [vmem:[#allocation2 + $0x8] sm:$0xff]  ;;  %245 = vmatpush.bf16.msra.mxu2 %v355_v2  ;;  %s283_s17 = sshll.u32 %s611_s16, 4  ;;  %s285_s19 = sshll.u32 %s743_s10, 4  ;;  %s284_s17 = int_to_ptr.vmem [resolvable:$true] %s283_s17  ;;  %s286_s19 = int_to_ptr.hbm [resolvable:$true] %s285_s19 }
  0x20   :  { %v135_v8 = vld [vmem:[#allocation5] sm:$0xff]  ;;  %v136_v9 = vld [vmem:[#allocation5 + $0x8] sm:$0xff]  ;;  %v138_v10 = vld [vmem:[#allocation7] sm:$0xff]  ;;  %v134_v12 = vpack.c.bf16 %v133_v7, %v132_v6  ;;  %s612_s9 = smov [#allocation16]   ;;  %s298_s0 = sshll.u32 %s744_s11, 4  ;;  %s299_s0 = int_to_ptr.hbm [resolvable:$true] %s298_s0 }
  0x21   :  { %v139_v11 = vld [vmem:[#allocation7 + $0x8] sm:$0xff]  ;;  %v137_v13 = vpack.c.bf16 %v136_v9, %v135_v8  ;;  %v369_v15 = vld [vmem:[%s737_s4] ss:$0 sm:$0xff]  ;;  %s610_s4 = smov [#allocation13]   ;;  %s296_s20 = sshll.u32 %s612_s9, 4  ;;  %s297_s20 = int_to_ptr.vmem [resolvable:$true] %s296_s20 }
  0x22   :  { %172 = vmatpush.bf16.msra.mxu0 %v350_v3  ;;  %209 = vmatpush.bf16.msra.mxu1 %v352_v4  ;;  %v140_v14 = vpack.c.bf16 %v139_v11, %v138_v10  ;;  %v370_v16 = vld [vmem:[%s739_s6] ss:$0 sm:$0xff]  ;;  %s270_s6 = sshll.u32 %s610_s4, 4  ;;  %s271_s6 = int_to_ptr.vmem [resolvable:$true] %s270_s6 }
  0x23   :  { %246 = vmatpush.bf16.msra.mxu2 %v354_v5  ;;  %v371_v23 = vld [vmem:[%s741_s8] ss:$0 sm:$0xff] }
  0x25   :  { %331 = vmatmul.msk.bf16.vlgmr.msra.gmra.mxu0 %vm161_vm0, %v134_v12  ;;  %340 = vmatmul.msk.bf16.vlgmr.msra.gmra.mxu1 %vm161_vm0, %v137_v13 }
  0x26   :  { %349 = vmatmul.msk.bf16.vlgmr.msra.gmra.mxu2 %vm161_vm0, %v140_v14 }
  0xa2   :  { %v174_v17 = vpop.f32.mrf.mxu0  ;;  %v211_v18 = vpop.f32.mrf.mxu1 }
  0xa3   :  { %v175_v19 = vadd.f32 %v369_v15, %v174_v17  ;;  %v212_v20 = vadd.f32 %v370_v16, %v211_v18 }
  0xa5   :  { %v253_v21 = vpack.c.bf16 %v175_v19, %v175_v19  ;;  %v258_v22 = vpack.c.bf16 %v212_v20, %v212_v20 }
  0xa7   :  { %256 = vst.msk [vmem:[#allocation13] sm:$0xf] %vm255_vm1, %v253_v21 }
  0xa8   :  { %260 = vst.msk [vmem:[#allocation14] sm:$0xf] %vm255_vm1, %v258_v22 }
  0xa9   :  { %v248_v24 = vpop.f32.mrf.mxu2 }
  0xaa   :  { %v249_v25 = vadd.f32 %v371_v23, %v248_v24  ;;  %v176_v26 = vpop.f32.mrf.mxu0  ;;  %v213_v27 = vpop.f32.mrf.mxu1 }
  0xab   :  { %v177_v28 = vadd.f32 %v369_v15, %v176_v26  ;;  %v214_v29 = vadd.f32 %v370_v16, %v213_v27 }
  0xac   :  { %v262_v30 = vpack.c.bf16 %v249_v25, %v249_v25 }
  0xad   :  { %v254_v31 = vpack.c.bf16 %v177_v28, %v177_v28  ;;  %v259_v32 = vpack.c.bf16 %v214_v29, %v214_v29 }
  0xae   :  { %264 = vst.msk [vmem:[#allocation16] sm:$0xf] %vm255_vm1, %v262_v30 }
  0xaf   :  { %257 = vst.msk [vmem:[#allocation13 + $0x4] sm:$0xf] %vm255_vm1, %v254_v31 }
  0xb0   :  { %261 = vst.msk [vmem:[#allocation14 + $0x4] sm:$0xf] %vm255_vm1, %v259_v32  ;;  %278 = dma.vmem_to_hbm [thread:$0]  %s271_s6, 128, %s273_s15, [#allocation4], %s604_s29, %s604_s29, %s605_s30  }
  0xb1   :  { %v250_v33 = vpop.f32.mrf.mxu2  ;;  %291 = dma.vmem_to_hbm [thread:$0]  %s284_s17, 128, %s286_s19, [#allocation15], %s604_s29, %s604_s29, %s605_s30  }
  0xb2   :  { %v251_v34 = vadd.f32 %v371_v23, %v250_v33 }
  0xb4   :  { %v263_v35 = vpack.c.bf16 %v251_v34, %v251_v34 }
  0xb6   :  { %265 = vst.msk [vmem:[#allocation16 + $0x4] sm:$0xf] %vm255_vm1, %v263_v35 }
  0xb7   :  { %304 = dma.vmem_to_hbm [thread:$0]  %s297_s20, 128, %s299_s0, [#allocation15], %s604_s29, %s604_s29, %s605_s30  }
  0xb8   :  { %596 = dma.done.wait [#allocation4], 128  }
  0xb9   :  { %597 = vsyncadd [#allocation4], 4294967168 }
  0xba   :  { %598 = dma.done.wait [#allocation15], 256  }
  0xbb   :  { %599 = vsyncadd [#allocation15], 4294967040 }
  0xbc   :  { %317 = vsyncpa [#allocation3], 1 }
  0xbd   :  { %318 = vsyncpa [#allocation6], 1 }
  0xbe   :  { %319 = vsyncpa [#allocation9], 1 }
  0xbf   :  { %320 = vsyncpa [#allocation12], 1 }
  0xc0   :  { %321 = vsyncpa [#allocation4], 1 }
  0xc1   :  { %322 = vsyncpa [#allocation15], 1 }

</bundles_post_ra>
